<compile_context>
chip_gen: v6e
topology: v6e:2x2x1
jax: 0.10.0
libtpu: 0.0.40
codegen_flags: <defaults>
</compile_context>

<pallas_src>
import functools

import jax
import jax.numpy as jnp
from jax import lax
from jax.experimental import pallas as pl
from jax.experimental.pallas import tpu as pltpu


def _round_up(v, m):
    return (v + m - 1) // m * m


def _choose_feature_tile(B, D, itemsize, target_bytes=4 * 1024 * 1024):
    """Pick lane tile tk (multiple of 128, divides Dp) and padded feature dim Dp.

    Padding is bounded: Dp is the next multiple of 128 (exact-divisor tiles), or --
    only when the exact-divisor tile would be tiny -- at most D/8 extra columns to
    reach a near-budget tile. No padding at all when D is already tk-aligned.
    """
    max_blocks = max(1, target_bytes // (B * 128 * itemsize))   # upper bound on tk/128
    Dp0 = _round_up(D, 128)
    m0 = Dp0 // 128
    if m0 <= max_blocks:                     # whole concept fits in one block
        return Dp0, Dp0
    best = 1                                 # largest divisor of m0 within budget
    for d in range(1, max_blocks + 1):
        if m0 % d == 0:
            best = d
    tk, Dp = best * 128, Dp0
    # If the exact-divisor tile is far below budget, accept bounded extra padding
    # (<= D/8) for a near-budget tile: big tiles amortize the ~0.35 us per-step cost.
    if best * 4 < max_blocks:
        tk_big = max_blocks * 128
        Dp_big = _round_up(D, tk_big)
        if Dp_big - Dp0 <= max(128, D // 8):
            tk, Dp = tk_big, Dp_big
    return tk, Dp


# ----------------------------------------------------------------------------
# Fused per-layer kernel: Gram accumulation + pairwise unbiased-HSIC / CKA
# ----------------------------------------------------------------------------
def _cka_layer_kernel(x_ref, out_ref, acc_ref, *, cn, n, n_pairs):
    c = pl.program_id(0)          # concept index
    k = pl.program_id(1)          # feature (reduction) chunk

    # ---- Gram accumulation: gram[c] (+)= x_chunk @ x_chunk^T -----------------
    x = x_ref[...]                # (B, tk) bf16
    gblk = lax.dot_general(x, x, (((1,), (1,)), ((), ())),
                           preferred_element_type=jnp.float32)       # (B, B) f32

    @pl.when(k == 0)
    def _init():                  # per-concept init: no global zero fill needed
        acc_ref[c] = gblk

    @pl.when(k > 0)
    def _accum():
        acc_ref[c] = acc_ref[c] + gblk

    # ---- Finalize: pairwise CKA on the VMEM-resident Gram tensor -------------
    last = jnp.logical_and(c == pl.num_programs(0) - 1,
                           k == pl.num_programs(1) - 1)

    @pl.when(last)
    def _finalize():
        g = acc_ref[...]                                     # (cn, n, n) f32
        row = lax.broadcasted_iota(jnp.int32, (n, n), 0)
        col = lax.broadcasted_iota(jnp.int32, (n, n), 1)
        offdiag = (row != col).astype(jnp.float32)
        g = g * offdiag[None, :, :]                          # x * (1 - eye)

        r = jnp.sum(g, axis=2)                               # (cn, n) row sums
        s = jnp.sum(r, axis=1, keepdims=True)                # (cn, 1) total sums

        # trace term: T[i, j] = sum_{a,b} g_i[a,b] * g_j[a,b]  (= tr(g_i g_j)).
        # Chunked over i (static unroll) so the peak temporary is (cn, n, n),
        # never (cn, cn, n, n) -- keeps the serial tail inside v7x's 64 MiB VMEM.
        colsel = lax.broadcasted_iota(jnp.int32, (cn, cn), 1)
        T = jnp.zeros((cn, cn), jnp.float32)
        for i in range(cn):
            ti = jnp.sum(g[i][None, :, :] * g, axis=2)       # (cn, n)
            ti = jnp.sum(ti, axis=1, keepdims=True)          # (cn, 1) = T[:, i]
            T = T + jnp.where(colsel == i, ti, 0.0)

        # ones^T g_i g_j ones == dot(rowsum_i, rowsum_j)  (grams are symmetric);
        # s_i * s_j via the same transpose-free dot_general on a broadcast of s.
        M2 = lax.dot_general(r, r, (((1,), (1,)), ((), ())),
                             preferred_element_type=jnp.float32)       # (cn, cn)
        sB = jnp.broadcast_to(s, (cn, n))
        S = lax.dot_general(r, sB, (((1,), (1,)), ((), ())),
                            preferred_element_type=jnp.float32)        # s_i * s_j

        hsic = (T + S * (1.0 / ((n - 1) * (n - 2)))
                - M2 * (2.0 / (n - 2))) * (1.0 / (n * (n - 3)))        # (cn, cn)

        ci = lax.broadcasted_iota(jnp.int32, (cn, cn), 0)
        cj = lax.broadcasted_iota(jnp.int32, (cn, cn), 1)
        eye_c = (ci == cj).astype(jnp.float32)
        # self-HSIC per concept (diagonal of hsic), relu'd; computed once,
        # reused by every pair.
        d = jnp.maximum(jnp.sum(hsic * eye_c, axis=1, keepdims=True), 0.0)  # (cn,1)
        dB = jnp.broadcast_to(d, (cn, n))
        denom = lax.dot_general(dB, dB, (((1,), (1,)), ((), ())),
                                preferred_element_type=jnp.float32) * (1.0 / n)
        cka = hsic * lax.rsqrt(jnp.maximum(denom, 1e-16))     # EUP rsqrt, no divide

        upper = (ci < cj).astype(jnp.float32)                # strict upper triangle
        tot = jnp.sum(jnp.abs(cka) * upper, axis=1, keepdims=True)     # (cn, 1)
        tot = jnp.sum(tot, axis=0, keepdims=True)                      # (1, 1)
        out_ref[...] = jnp.broadcast_to(tot * (1.0 / n_pairs), (1, 128))


def cka_layer_loss(blocks, cha_per_con, *, target_block_bytes=4 * 1024 * 1024,
                   stream_dtype=jnp.bfloat16):
    """Mean |CKA| over all concept pairs of one layer's activations (B, C, H, W)."""
    B, C, H, W = blocks.shape
    assert C % cha_per_con == 0, "channels must be divisible by concept_cha"
    cn = C // cha_per_con
    assert cn >= 2, "need at least two concepts for pairwise CKA"
    assert B >= 4, "unbiased HSIC requires batch size >= 4"
    D = cha_per_con * H * W

    # Pure reshape (no HBM transpose): concept c occupies lanes [c*Dp, (c+1)*Dp).
    # Stream bf16 (f32 accumulation inside the kernel) -- the kernel is HBM-bound.
    itemsize = jnp.dtype(stream_dtype).itemsize
    x = blocks.reshape(B, cn, D).astype(stream_dtype)
    tk, Dp = _choose_feature_tile(B, D, itemsize, target_block_bytes)
    if Dp != D:
        # zeros don't change x x^T; pad is skipped entirely when D is tk-aligned.
        x = jnp.pad(x, ((0, 0), (0, 0), (0, Dp - D)))
    x = x.reshape(B, cn * Dp)
    num_k = Dp // tk
    n_pairs = cn * (cn - 1) // 2

    kern = functools.partial(_cka_layer_kernel, cn=cn, n=B, n_pairs=n_pairs)
    out = pl.pallas_call(
        kern,
        out_shape=jax.ShapeDtypeStruct((1, 128), jnp.float32),
        grid_spec=pltpu.PrefetchScalarGridSpec(
            num_scalar_prefetch=0,
            grid=(cn, num_k),
            in_specs=[pl.BlockSpec(
                (B, tk), lambda c, k, _nk=num_k: (0, c * _nk + k))],
            out_specs=pl.BlockSpec((1, 128), lambda c, k: (0, 0)),
            scratch_shapes=[pltpu.VMEM((cn, B, B), jnp.float32)],
        ),
        compiler_params=pltpu.CompilerParams(
            # Both axes carry the shared Gram accumulator / fused finalize step,
            # so they must stay sequential ("arbitrary").
            dimension_semantics=("arbitrary", "arbitrary"),
            # 48 MiB: above v5e's 16 MiB scoped default (needed for the 2x4 MiB
            # double-buffered blocks) and safely under v7x's 64 MiB physical VMEM.
            vmem_limit_bytes=48 * 1024 * 1024,
        ),
    )(x)
    return out[0, 0]


def cka_loss(concept_pools, concept_cha, **kwargs):
    total = jnp.zeros((), jnp.float32)
    for layer_i, blocks in enumerate(concept_pools):
        total = total + cka_layer_loss(blocks, concept_cha[layer_i], **kwargs)
    return total


# ----------------------------------------------------------------------------
# Pure-JAX reference (mirrors the PyTorch module) for correctness validation
# ----------------------------------------------------------------------------
def _hsic_ref(x, y):
    n = x.shape[1]
    mask = jnp.eye(n, dtype=x.dtype)[None]
    x = x * (1 - mask)
    y = y * (1 - mask)
    trace = jnp.sum(
        jnp.matmul(x, jnp.swapaxes(y, -1, -2)) * mask, axis=(-1, -2), keepdims=True)
    n1 = jnp.sum(x, axis=(-2, -1), keepdims=True)
    n2 = jnp.sum(y, axis=(-2, -1), keepdims=True)
    middle = n1 * n2 / ((n - 1) * (n - 2))
    ones = jnp.ones((x.shape[0], n, 1), x.dtype)
    mult2 = jnp.matmul(jnp.matmul(jnp.swapaxes(ones, -1, -2), x), jnp.matmul(y, ones))
    last = 2.0 / (n - 2) * mult2
    return 1.0 / (n * (n - 3)) * (trace + middle - last)


def cka_loss_ref(concept_pools, concept_cha, cast_dtype=None):
    total = jnp.zeros((), jnp.float32)
    for layer_i, blocks in enumerate(concept_pools):
        B, C, H, W = blocks.shape
        cc = concept_cha[layer_i]
        cn = C // cc
        xb = blocks
        if cast_dtype is not None:          # match the kernel's streaming precision
            xb = xb.astype(cast_dtype).astype(jnp.float32)
        x = xb.reshape(B, cn, cc, H, W).transpose(1, 0, 2, 3, 4).reshape(cn, B, -1)
        gram = jnp.matmul(x, jnp.swapaxes(x, -1, -2))
        i0, i1 = jnp.triu_indices(cn, k=1)
        nom = _hsic_ref(gram[i0], gram[i1])
        d1 = jax.nn.relu(_hsic_ref(gram[i0], gram[i0]))
        d2 = jax.nn.relu(_hsic_ref(gram[i1], gram[i1]))
        cka = nom / jnp.sqrt(jnp.maximum(d1 * d2, 1e-16))
        total = total + jnp.mean(jnp.abs(cka))
    return total


if __name__ == "__main__":
    key = jax.random.PRNGKey(0)
    k1, k2 = jax.random.split(key)

    # B must be >= 4 so the unbiased-HSIC denominators (n-2), (n-3) are valid,
    # exactly as the PyTorch module implicitly assumes for its batch dimension.
    concept_cha = [4, 4]
    concept_pools = [
        jax.random.normal(k1, (8, 8, 16, 16), jnp.float32),   # B=8, C=8  -> 2 concepts
        jax.random.normal(k2, (8, 12, 8, 8), jnp.float32),    # B=8, C=12 -> 3 concepts
    ]

    loss = jax.block_until_ready(cka_loss(concept_pools, concept_cha))
    # Reference uses the same bf16 input rounding as the kernel's streaming dtype
    # (accumulation is f32 in both), so the comparison isolates the kernel math.
    ref = jax.block_until_ready(
        cka_loss_ref(concept_pools, concept_cha, cast_dtype=jnp.bfloat16))
    assert jnp.isfinite(loss), loss
    assert jnp.allclose(loss, ref, rtol=1e-2, atol=1e-4), (loss, ref)

    print("KERNEL_OK")
</pallas_src>

<mosaic_0001>
module attributes {stable_mosaic.version = 11 : i64} {
  func.func @_cka_layer_kernel(%arg0: i32, %arg1: i32, %arg2: memref<8x1024xbf16, #tpu.memory_space<vmem>>, %arg3: memref<1x128xf32, #tpu.memory_space<vmem>>, %arg4: memref<2x8x8xf32, #tpu.memory_space<vmem>>) attributes {dimension_semantics = [#tpu.dimension_semantics<arbitrary>, #tpu.dimension_semantics<arbitrary>], iteration_bounds = array<i64: 2, 1>, scalar_prefetch = 0 : i64, scratch_operands = 1 : i64, tpu.core_type = #tpu.core_type<tc>, window_params = [{transform_indices = @transform_0, window_bounds = array<i64: 8, 1024>}, {pipeline_mode = #tpu.pipeline_mode<synchronous>, transform_indices = @transform_1, window_bounds = array<i64: 1, 128>}]} {
    %c0 = arith.constant 0 : index
    %c0_0 = arith.constant 0 : index
    %0 = vector.load %arg2[%c0, %c0_0] : memref<8x1024xbf16, #tpu.memory_space<vmem>>, vector<8x1024xbf16>
    %cst = arith.constant dense<0.000000e+00> : vector<8x8xf32>
    %1 = tpu.matmul %0, %0, %cst {dimension_numbers = #tpu.dot_dimension_numbers<[1], [1], [0], [0], [0, 0, 1, 0], [], []>} : vector<8x1024xbf16>, vector<8x1024xbf16>, vector<8x8xf32> -> vector<8x8xf32>
    %c0_i32 = arith.constant 0 : i32
    %2 = arith.cmpi eq, %arg1, %c0_i32 : i32
    %3 = arith.extui %2 : i1 to i32
    %c0_i32_1 = arith.constant 0 : i32
    %4 = arith.cmpi ne, %3, %c0_i32_1 : i32
    scf.if %4 {
      %13 = arith.index_cast %arg0 : i32 to index
      %c0_6 = arith.constant 0 : index
      %c0_7 = arith.constant 0 : index
      %14 = vector.load %arg4[%13, %c0_6, %c0_7] : memref<2x8x8xf32, #tpu.memory_space<vmem>>, vector<1x8x8xf32>
      %15 = vector.shape_cast %14 : vector<1x8x8xf32> to vector<8x8xf32>
      %16 = vector.shape_cast %1 : vector<8x8xf32> to vector<1x8x8xf32>
      tpu.vector_store %arg4[%13, %c0_6, %c0_7], %16 {strides = array<i32>} : memref<2x8x8xf32, #tpu.memory_space<vmem>>, vector<1x8x8xf32>,
    } else {
    }
    %c0_i32_2 = arith.constant 0 : i32
    %5 = arith.cmpi sgt, %arg1, %c0_i32_2 : i32
    %6 = arith.extui %5 : i1 to i32
    %c0_i32_3 = arith.constant 0 : i32
    %7 = arith.cmpi ne, %6, %c0_i32_3 : i32
    scf.if %7 {
      %13 = arith.index_cast %arg0 : i32 to index
      %c0_6 = arith.constant 0 : index
      %c0_7 = arith.constant 0 : index
      %14 = vector.load %arg4[%13, %c0_6, %c0_7] : memref<2x8x8xf32, #tpu.memory_space<vmem>>, vector<1x8x8xf32>
      %15 = vector.shape_cast %14 : vector<1x8x8xf32> to vector<8x8xf32>
      %16 = arith.addf %15, %1 : vector<8x8xf32>
      %17 = arith.index_cast %arg0 : i32 to index
      %c0_8 = arith.constant 0 : index
      %c0_9 = arith.constant 0 : index
      %18 = vector.load %arg4[%17, %c0_8, %c0_9] : memref<2x8x8xf32, #tpu.memory_space<vmem>>, vector<1x8x8xf32>
      %19 = vector.shape_cast %18 : vector<1x8x8xf32> to vector<8x8xf32>
      %20 = vector.shape_cast %16 : vector<8x8xf32> to vector<1x8x8xf32>
      tpu.vector_store %arg4[%17, %c0_8, %c0_9], %20 {strides = array<i32>} : memref<2x8x8xf32, #tpu.memory_space<vmem>>, vector<1x8x8xf32>,
    } else {
    }
    %c1_i32 = arith.constant 1 : i32
    %8 = arith.cmpi eq, %arg0, %c1_i32 : i32
    %c0_i32_4 = arith.constant 0 : i32
    %9 = arith.cmpi eq, %arg1, %c0_i32_4 : i32
    %10 = arith.andi %8, %9 : i1
    %11 = arith.extui %10 : i1 to i32
    %c0_i32_5 = arith.constant 0 : i32
    %12 = arith.cmpi ne, %11, %c0_i32_5 : i32
    scf.if %12 {
      %c0_6 = arith.constant 0 : index
      %c0_7 = arith.constant 0 : index
      %c0_8 = arith.constant 0 : index
      %13 = vector.load %arg4[%c0_6, %c0_7, %c0_8] : memref<2x8x8xf32, #tpu.memory_space<vmem>>, vector<2x8x8xf32>
      %14 = tpu.iota {dimensions = array<i32: 0>} : vector<8x8xi32>
      %15 = tpu.iota {dimensions = array<i32: 1>} : vector<8x8xi32>
      %16 = arith.cmpi ne, %14, %15 : vector<8x8xi32>
      %17 = arith.extui %16 : vector<8x8xi1> to vector<8x8xi32>
      %18 = arith.sitofp %17 : vector<8x8xi32> to vector<8x8xf32>
      %19 = vector.shape_cast %18 : vector<8x8xf32> to vector<1x8x8xf32>
      %20 = vector.broadcast %19 : vector<1x8x8xf32> to vector<2x8x8xf32>
      %21 = arith.mulf %13, %20 : vector<2x8x8xf32>
      %cst_9 = arith.constant dense<0.000000e+00> : vector<2x8xf32>
      %22 = vector.multi_reduction <add>, %21, %cst_9 [2] : vector<2x8x8xf32> to vector<2x8xf32>
      %cst_10 = arith.constant dense<0.000000e+00> : vector<2xf32>
      %23 = vector.multi_reduction <add>, %22, %cst_10 [1] : vector<2x8xf32> to vector<2xf32>
      %24 = vector.shape_cast %23 : vector<2xf32> to vector<2x1xf32>
      %25 = tpu.iota {dimensions = array<i32: 1>} : vector<2x2xi32>
      %cst_11 = arith.constant 0.000000e+00 : f32
      %26 = vector.broadcast %cst_11 : f32 to vector<2x2xf32>
      %27 = vector.extract_strided_slice %21 {offsets = [0, 0, 0], sizes = [1, 8, 8], strides = [1, 1, 1]} : vector<2x8x8xf32> to vector<1x8x8xf32>
      %28 = vector.shape_cast %27 : vector<1x8x8xf32> to vector<8x8xf32>
      %29 = vector.shape_cast %28 : vector<8x8xf32> to vector<1x8x8xf32>
      %30 = vector.broadcast %29 : vector<1x8x8xf32> to vector<2x8x8xf32>
      %31 = arith.mulf %30, %21 : vector<2x8x8xf32>
      %cst_12 = arith.constant dense<0.000000e+00> : vector<2x8xf32>
      %32 = vector.multi_reduction <add>, %31, %cst_12 [2] : vector<2x8x8xf32> to vector<2x8xf32>
      %cst_13 = arith.constant dense<0.000000e+00> : vector<2xf32>
      %33 = vector.multi_reduction <add>, %32, %cst_13 [1] : vector<2x8xf32> to vector<2xf32>
      %34 = vector.shape_cast %33 : vector<2xf32> to vector<2x1xf32>
      %c0_i32_14 = arith.constant 0 : i32
      %35 = vector.broadcast %c0_i32_14 : i32 to vector<2x2xi32>
      %36 = arith.cmpi eq, %25, %35 : vector<2x2xi32>
      %cst_15 = arith.constant 0.000000e+00 : f32
      %37 = vector.shape_cast %34 : vector<2x1xf32> to vector<2x1xf32>
      %38 = vector.broadcast %37 : vector<2x1xf32> to vector<2x2xf32>
      %39 = vector.broadcast %cst_15 : f32 to vector<2x2xf32>
      %40 = arith.select %36, %38, %39 : vector<2x2xi1>, vector<2x2xf32>
      %41 = arith.addf %26, %40 : vector<2x2xf32>
      %42 = vector.extract_strided_slice %21 {offsets = [1, 0, 0], sizes = [1, 8, 8], strides = [1, 1, 1]} : vector<2x8x8xf32> to vector<1x8x8xf32>
      %43 = vector.shape_cast %42 : vector<1x8x8xf32> to vector<8x8xf32>
      %44 = vector.shape_cast %43 : vector<8x8xf32> to vector<1x8x8xf32>
      %45 = vector.broadcast %44 : vector<1x8x8xf32> to vector<2x8x8xf32>
      %46 = arith.mulf %45, %21 : vector<2x8x8xf32>
      %cst_16 = arith.constant dense<0.000000e+00> : vector<2x8xf32>
      %47 = vector.multi_reduction <add>, %46, %cst_16 [2] : vector<2x8x8xf32> to vector<2x8xf32>
      %cst_17 = arith.constant dense<0.000000e+00> : vector<2xf32>
      %48 = vector.multi_reduction <add>, %47, %cst_17 [1] : vector<2x8xf32> to vector<2xf32>
      %49 = vector.shape_cast %48 : vector<2xf32> to vector<2x1xf32>
      %c1_i32_18 = arith.constant 1 : i32
      %50 = vector.broadcast %c1_i32_18 : i32 to vector<2x2xi32>
      %51 = arith.cmpi eq, %25, %50 : vector<2x2xi32>
      %cst_19 = arith.constant 0.000000e+00 : f32
      %52 = vector.shape_cast %49 : vector<2x1xf32> to vector<2x1xf32>
      %53 = vector.broadcast %52 : vector<2x1xf32> to vector<2x2xf32>
      %54 = vector.broadcast %cst_19 : f32 to vector<2x2xf32>
      %55 = arith.select %51, %53, %54 : vector<2x2xi1>, vector<2x2xf32>
      %56 = arith.addf %41, %55 : vector<2x2xf32>
      %cst_20 = arith.constant dense<0.000000e+00> : vector<2x2xf32>
      %57 = tpu.matmul %22, %22, %cst_20 {dimension_numbers = #tpu.dot_dimension_numbers<[1], [1], [0], [0], [0, 0, 1, 0], [], []>} : vector<2x8xf32>, vector<2x8xf32>, vector<2x2xf32> -> vector<2x2xf32>
      %58 = vector.shape_cast %24 : vector<2x1xf32> to vector<2x1xf32>
      %59 = vector.broadcast %58 : vector<2x1xf32> to vector<2x8xf32>
      %cst_21 = arith.constant dense<0.000000e+00> : vector<2x2xf32>
      %60 = tpu.matmul %22, %59, %cst_21 {dimension_numbers = #tpu.dot_dimension_numbers<[1], [1], [0], [0], [0, 0, 1, 0], [], []>} : vector<2x8xf32>, vector<2x8xf32>, vector<2x2xf32> -> vector<2x2xf32>
      %cst_22 = arith.constant 0.0238095243 : f32
      %61 = vector.broadcast %cst_22 : f32 to vector<2x2xf32>
      %62 = arith.mulf %60, %61 : vector<2x2xf32>
      %63 = arith.addf %56, %62 : vector<2x2xf32>
      %cst_23 = arith.constant 0.333333343 : f32
      %64 = vector.broadcast %cst_23 : f32 to vector<2x2xf32>
      %65 = arith.mulf %57, %64 : vector<2x2xf32>
      %66 = arith.subf %63, %65 : vector<2x2xf32>
      %cst_24 = arith.constant 2.500000e-02 : f32
      %67 = vector.broadcast %cst_24 : f32 to vector<2x2xf32>
      %68 = arith.mulf %66, %67 : vector<2x2xf32>
      %69 = tpu.iota {dimensions = array<i32: 0>} : vector<2x2xi32>
      %70 = tpu.iota {dimensions = array<i32: 1>} : vector<2x2xi32>
      %71 = arith.cmpi eq, %69, %70 : vector<2x2xi32>
      %72 = arith.extui %71 : vector<2x2xi1> to vector<2x2xi32>
      %73 = arith.sitofp %72 : vector<2x2xi32> to vector<2x2xf32>
      %74 = arith.mulf %68, %73 : vector<2x2xf32>
      %cst_25 = arith.constant dense<0.000000e+00> : vector<2xf32>
      %75 = vector.multi_reduction <add>, %74, %cst_25 [1] : vector<2x2xf32> to vector<2xf32>
      %76 = vector.shape_cast %75 : vector<2xf32> to vector<2x1xf32>
      %cst_26 = arith.constant 0.000000e+00 : f32
      %77 = vector.broadcast %cst_26 : f32 to vector<2x1xf32>
      %78 = arith.maximumf %76, %77 : vector<2x1xf32>
      %79 = vector.shape_cast %78 : vector<2x1xf32> to vector<2x1xf32>
      %80 = vector.broadcast %79 : vector<2x1xf32> to vector<2x8xf32>
      %cst_27 = arith.constant dense<0.000000e+00> : vector<2x2xf32>
      %81 = tpu.matmul %80, %80, %cst_27 {dimension_numbers = #tpu.dot_dimension_numbers<[1], [1], [0], [0], [0, 0, 1, 0], [], []>} : vector<2x8xf32>, vector<2x8xf32>, vector<2x2xf32> -> vector<2x2xf32>
      %cst_28 = arith.constant 1.250000e-01 : f32
      %82 = vector.broadcast %cst_28 : f32 to vector<2x2xf32>
      %83 = arith.mulf %81, %82 : vector<2x2xf32>
      %cst_29 = arith.constant 1.000000e-16 : f32
      %84 = vector.broadcast %cst_29 : f32 to vector<2x2xf32>
      %85 = arith.maximumf %83, %84 : vector<2x2xf32>
      %86 = math.rsqrt %85 : vector<2x2xf32>
      %87 = arith.mulf %68, %86 : vector<2x2xf32>
      %88 = arith.cmpi slt, %69, %70 : vector<2x2xi32>
      %89 = arith.extui %88 : vector<2x2xi1> to vector<2x2xi32>
      %90 = arith.sitofp %89 : vector<2x2xi32> to vector<2x2xf32>
      %91 = math.absf %87 : vector<2x2xf32>
      %92 = arith.mulf %91, %90 : vector<2x2xf32>
      %cst_30 = arith.constant dense<0.000000e+00> : vector<2xf32>
      %93 = vector.multi_reduction <add>, %92, %cst_30 [1] : vector<2x2xf32> to vector<2xf32>
      %94 = vector.shape_cast %93 : vector<2xf32> to vector<2x1xf32>
      %cst_31 = arith.constant dense<0.000000e+00> : vector<1xf32>
      %95 = vector.multi_reduction <add>, %94, %cst_31 [0] : vector<2x1xf32> to vector<1xf32>
      %96 = vector.shape_cast %95 : vector<1xf32> to vector<1x1xf32>
      %cst_32 = arith.constant 1.000000e+00 : f32
      %97 = vector.broadcast %cst_32 : f32 to vector<1x1xf32>
      %98 = arith.mulf %96, %97 : vector<1x1xf32>
      %99 = vector.shape_cast %98 : vector<1x1xf32> to vector<1x1xf32>
      %100 = vector.broadcast %99 : vector<1x1xf32> to vector<1x128xf32>
      %c0_33 = arith.constant 0 : index
      %c0_34 = arith.constant 0 : index
      %101 = vector.load %arg3[%c0_33, %c0_34] : memref<1x128xf32, #tpu.memory_space<vmem>>, vector<1x128xf32>
      tpu.vector_store %arg3[%c0_33, %c0_34], %100 {strides = array<i32>} : memref<1x128xf32, #tpu.memory_space<vmem>>, vector<1x128xf32>,
    } else {
    }
    return
  }
  func.func @transform_0(%arg0: i32, %arg1: i32) -> (i32, i32) {
    %c1_i32 = arith.constant 1 : i32
    %0 = arith.muli %arg0, %c1_i32 : i32
    %1 = arith.addi %0, %arg1 : i32
    %c0_i32 = arith.constant 0 : i32
    %c0_i32_0 = arith.constant 0 : i32
    return %c0_i32, %1 : i32, i32
  }
  func.func @transform_1(%arg0: i32, %arg1: i32) -> (i32, i32) {
    %c0_i32 = arith.constant 0 : i32
    %c0_i32_0 = arith.constant 0 : i32
    %c0_i32_1 = arith.constant 0 : i32
    return %c0_i32, %c0_i32_0 : i32, i32
  }
}

</mosaic_0001>

<bundles_post_ra>
// kernel: tpu_custom_call.1
= control target key start
LH: loop header
LB: loop body
LE: loop exit
PB: predicated region body
PF: predicated region fallthrough
CT: control target
= control target key end

     0   :  { %6 = vsyncpa [#allocation4], 0  ;;  %s1171_s0 = inlined_call_operand.hbm [shape: bf16[8,2048], index: 0, kind: input, shape index: {}]   ;;  %s1172_s1 = inlined_call_operand.hbm [shape: f32[1,128], index: 1, kind: output, shape index: {}]  }
   0x1   :  { %8 = vsyncpa [#allocation4 + $0x1], 0 }
   0x2   :  { %9 = vsyncpa [#allocation5], 0  ;;  %s1007_s6 = smov 0   ;;  %s1009_s7 = smov 0  }
   0x3   :  { %s1011_s8 = smov 0   ;;  %s1013_s9 = smov 0  }
   0x4   :  { %s1015_s10 = smov 0   ;;  %s1017_s11 = smov 0  }
   0x5 LB: > { %s756_s12 = sadd.s32 4294967295, %s991_s11   ;;  %s27_s13 = sadd.s32 1, %s987_s10  ;;  %s991_s11 = sphi %s1017_s11, %s15_s11   ;;  %s987_s10 = sphi %s1015_s10, %s1181_s10   ;;  %s983_s9 = sphi %s1013_s9, %s1180_s9   ;;  %s979_s8 = sphi %s1011_s8, %s1179_s8   ;;  %s975_s7 = sphi %s1009_s7, %s1178_s7   ;;  %s971_s6 = sphi %s1007_s6, %s1177_s6  }
   0x6   : > { %p29_p0 = scmp.ge.s32.totalorder %s27_s13, 2  ;;  %s36_s14 = sadd.s32 1, %s979_s8 }
   0x7   : > { %p43_p1 = scmp.ne.s32.totalorder %s979_s8, %s975_s7  ;;  %p44_p2 = scmp.eq.s32.totalorder %s991_s11, 0 }
   0x8   : > { %s1183_s13 = smov (%p29_p0, %s27_s13), 0  ;;  %p49_p4 = scmp.ne.s32.totalorder %s975_s7, %s971_s6 }
   0x9   : > { %p1043_p3 = por %p44_p2, %p43_p1  ;;  %s33_s16 = ssub.s32 %s987_s10, %s1183_s13 }
   0xa   : > { %p50_p5 = scmp.eq.s32.totalorder %s756_s12, 0  ;;  %p34_p6 = scmp.eq.s32.totalorder %s33_s16, 0 }
   0xb   : > { %p821_p8 = scmp.lt.s32.totalorder %s991_s11, 2  ;;  %s94_s19 = sand.u32 1, %s979_s8  }
   0xc   : > { %p1052_p7 = por %p50_p5, %p49_p4  ;;  %s788_s20 = sshll.u32 %s987_s10, 9 }
   0xd   : > { %s1058_s18 = scalar_select %p34_p6, %s979_s8, %s36_s14  }
   0xe   : > { %s759_s21 = sshll.u32 %s94_s19, 5  ;;  %s105_s24 = scalar_lea.hbm %s1171_s0, %s788_s20 }
   0xf   : > { %s98_s25 = scalar_lea.vmem [#allocation3], %s759_s21  ;;  %p1067_p9 = pnand %p821_p8, %p1043_p3 }
  0x10   : > { %s107_s26 = sshll.u32 %s98_s25, 4  ;;  %p762_p10 = scmp.ge.s32.totalorder %s991_s11, 1  ;;  %s108_s26 = int_to_ptr.vmem [resolvable:$true] %s107_s26 }
  0x11   : > { %p112_p11 = scmp.lt.s32.totalorder %s991_s11, 3  ;;  %s95_s28 = scalar_lea.sflag [#allocation4], %s94_s19 }
  0x12   : > { %p887_p12 = pneg %p1067_p9  ;;  %s898_s29 = scalar_lea.vmem %s108_s26, 512 }
  0x13   : > { %p899_p13 = scmp.ne.s32.totalorder %s108_s26, %s898_s29  ;;  %s993_s30 = smov [#allocation3]  }
  0x14   : > { %s903_s2 = sshll.u32 %s993_s30, 4  ;;  %s904_s2 = int_to_ptr.vmem [resolvable:$false] %s903_s2 }
  0x15   : > { %p901_p0 = pnand %p899_p13, %p887_p12  ;;  %s905_s3 = scalar_lea.vmem %s904_s2, 1024 }
  0x16   : > { %p906_p2 = scmp.lt.s32.totalorder %s108_s26, %s904_s2  ;;  %p907_p3 = scmp.lt.s32.totalorder %s905_s3, %s898_s29 }
  0x17   : > { %p902_p1 = pneg %p901_p0 }
  0x18   : > { %p908_p4 = por %p907_p3, %p906_p2 }
  0x1a   : > { %p909_p5 = pnand %p908_p4, %p902_p1 }
  0x1c   : > { %912 = shalt.err (!%p909_p5)
}
  0x1d   : > { %820 = dma.hbm_to_vmem [thread:$0]  (!%p1067_p9), %s105_s24, 512, %s108_s26, %s95_s28  }
  0x1e   : > { %p113_p6 = pnand %p762_p10, %p112_p11 }
  0x1f   : > { %s118_s4 = sand.u32 (!%p113_p6), 1, %s975_s7  }
  0x20   : > { %116 = sbr.rel (%p113_p6) target bundleno = 1284 (0x504), region = 24  ;;  %s763_s5 = sshll.u32 (!%p113_p6), %s118_s4, 5 }
  0x21   : > { %s119_s6 = scalar_lea.sflag (!%p113_p6), [#allocation4], %s118_s4  ;;  %s122_s14 = scalar_lea.vmem (!%p113_p6), [#allocation3], %s763_s5 }
  0x25   : > { %962 = dma.done.wait (%p1052_p7), %s119_s6, 512  }
  0x26   : > { %964 = vsyncadd (%p1052_p7), %s119_s6, 4294966784  ;;  %v139_v0 = vld [vmem:[%s122_s14] sm:$0xff]  ;;  %v140_v1 = vld [vmem:[%s122_s14 + $0x8] sm:$0xff]  ;;  %p349_p7 = scmp.eq.s32.totalorder %s983_s9, 1  ;;  %s772_s15 = sshll.u32 %s983_s9, 3  ;;  %vm337_vm0 = vcmask 64512  }
  0x27   : > { %v141_v2 = vld [vmem:[%s122_s14 + $0x10] sm:$0xff]  ;;  %v765_v3 = vcombine.high %v139_v0, %v139_v0  ;;  %v767_v4 = vcombine.high %v140_v1, %v140_v1  ;;  %v764_v5 = vcombine.low %v139_v0, %v139_v0  ;;  %v766_v6 = vcombine.low %v140_v1, %v140_v1  ;;  %v142_v7 = vld [vmem:[%s122_s14 + $0x18] sm:$0xff]  ;;  %s336_s16 = scalar_lea.vmem [#allocation2], %s772_s15 }
  0x28   : > { %v769_v8 = vcombine.high %v141_v2, %v141_v2  ;;  %v771_v9 = vcombine.high %v142_v7, %v142_v7  ;;  %v768_v10 = vcombine.low %v141_v2, %v141_v2  ;;  %v770_v11 = vcombine.low %v142_v7, %v142_v7 }
  0x29   : > { %185 = vmatprep.subr.bf16.mxu0 %v765_v3  ;;  %225 = vmatprep.subr.bf16.mxu1 %v767_v4  ;;  %v356_v31 = vlaneseq (%p349_p7)  ;;  %v994_v32 = vmov (%p349_p7), 0.0   ;;  %vm995_vm2 = vmmov (%p349_p7), 0   ;;  %vm382_vm3 = vcmask (%p349_p7), 1041409  }
  0x2a   : > { %186 = vmatpush1.bf16.xpose.msra.mxu0 %v764_v5  ;;  %226 = vmatpush1.bf16.xpose.msra.mxu1 %v766_v6  ;;  %vm385_vm4 = vcmask (%p349_p7), 58368   ;;  %vm586_vm8 = vcmask (%p349_p7), 9216   ;;  %vm676_vm10 = vcmask (%p349_p7), 1041408  }
  0x2b   : > { %203 = vmatprep.mubr.bf16.mxu0 %v765_v3  ;;  %243 = vmatprep.mubr.bf16.mxu1 %v767_v4  ;;  %v1093_v33 = vshrl.u32 (%p349_p7), %v356_v31, 7  ;;  %v1095_v34 = vand.u32 (%p349_p7), 127, %v356_v31 }
  0x2c   : > { %265 = vmatprep.subr.bf16.mxu0 %v769_v8  ;;  %305 = vmatprep.subr.bf16.mxu1 %v771_v9 }
  0x2d   : > { %vm360_vm1 = vcmp.ne.s32.totalorder (%p349_p7), %v1093_v33, %v1095_v34  ;;  %v376_v45 = vsub.s32 (%p349_p7), %v1095_v34, %v1093_v33  ;;  %vm429_vm5 = vcmp.eq.s32.totalorder (%p349_p7), %v1095_v34, 1  ;;  %vm412_vm6 = vcmp.eq.s32.totalorder (%p349_p7), %v1095_v34, 0 }
  0x2e   : > { %v775_v37 = vsel (%p349_p7), %vm360_vm1, 1.0, %v994_v32  ;;  %vm582_vm7 = vcmp.eq.s32.totalorder (%p349_p7), %v1093_v33, %v1095_v34  ;;  %vm668_vm9 = vcmp.lt.s32.totalorder (%p349_p7), %v1093_v33, %v1095_v34 }
  0x31   : > { %204 = vmatmul.mubr.bf16.vlgmr.msra.gmra.mxu0 %v764_v5  ;;  %244 = vmatmul.mubr.bf16.vlgmr.msra.gmra.mxu1 %v766_v6 }
  0x32   : > { %266 = vmatpush1.bf16.xpose.msra.mxu0 %v768_v10  ;;  %306 = vmatpush1.bf16.xpose.msra.mxu1 %v770_v11 }
  0x33   : > { %283 = vmatprep.mubr.bf16.mxu0 %v769_v8  ;;  %323 = vmatprep.mubr.bf16.mxu1 %v771_v9 }
  0x34   : > { %796 = vmatprep.subr.mxu0 (%p349_p7), %v994_v32  ;;  %801 = vmatprep.subr.mxu1 (%p349_p7), %v994_v32 }
  0x39   : > { %284 = vmatmul.mubr.bf16.vlgmr.msra.gmra.mxu0 %v768_v10  ;;  %324 = vmatmul.mubr.bf16.vlgmr.msra.gmra.mxu1 %v770_v11 }
  0x3a   : > { %798 = vmatprep.mubr.msk.f32.mxu0 (%p349_p7), %vm995_vm2, %v994_v32  ;;  %803 = vmatprep.mubr.msk.f32.mxu1 (%p349_p7), %vm995_vm2, %v994_v32 }
  0xf1   : > { %v205_v12 = vpop.f32.mrf.mxu0  ;;  %v245_v13 = vpop.f32.mrf.mxu1 }
  0xf2   : > { %v246_v20 = vadd.f32 %v245_v13, %v205_v12 }
  0xf3   : > { %v207_v14 = vpop.f32.mrf.mxu0  ;;  %v247_v15 = vpop.f32.mrf.mxu1 }
  0xf4   : > { %v780_v15 = vsel (%p349_p7), %vm582_vm7, 1.0, %v994_v32 }
  0xf5   : > { %v208_v16 = vpop.f32.mrf.mxu0  ;;  %v248_v17 = vpop.f32.mrf.mxu1 }
  0xf7   : > { %v209_v18 = vpop.f32.mrf.mxu0  ;;  %v249_v19 = vpop.f32.mrf.mxu1 }
  0xf9   : > { %v285_v21 = vpop.f32.mrf.mxu0  ;;  %v325_v22 = vpop.f32.mrf.mxu1 }
  0xfa   : > { %v286_v23 = vadd.f32 %v285_v21, %v246_v20 }
  0xfb   : > { %v287_v24 = vpop.f32.mrf.mxu0  ;;  %v327_v25 = vpop.f32.mrf.mxu1  ;;  %353 = sbr.rel (!%p349_p7) target bundleno = 1269 (0x4f5), region = 40 }
  0xfc   : > { %v326_v26 = vadd.f32 %v325_v22, %v286_v23 }
  0xfd   : > { %v288_v27 = vpop.f32.mrf.mxu0  ;;  %v328_v28 = vpop.f32.mrf.mxu1 }
  0xfe   : > { %338 = vst.msk [vmem:[%s336_s16] sm:$0xff] %vm337_vm0, %v326_v26  ;;  %v783_v27 = vsel (%p349_p7), %vm668_vm9, 1.0, %v994_v32 }
  0xff   : > { %v289_v29 = vpop.f32.mrf.mxu0  ;;  %v329_v30 = vpop.f32.mrf.mxu1 }
 0x105   : > { %v354_v35 = vld [vmem:[#allocation2] sm:$0xff]  ;;  %v355_v36 = vld [vmem:[#allocation2 + $0x8] sm:$0xff] }
 0x106   : > { %v363_v38 = vmul.f32 %v775_v37, %v354_v35  ;;  %v364_v39 = vmul.f32 %v775_v37, %v355_v36 }
 0x108   : > { %v366_v40 = vsel %vm337_vm0, %v363_v38, 0.0  ;;  %v369_v41 = vsel %vm337_vm0, %v364_v39, 0.0  ;;  %v390_v42 = vmul.f32 %v364_v39, %v363_v38  ;;  %v389_v49 = vmul.f32 %v363_v38, %v363_v38 }
 0x109   : > { %367 = vadd.xlane.f32.xlu0 %v366_v40  ;;  %v415_v53 = vmul.f32 %v364_v39, %v364_v39 }
 0x10a   : > { %v394_v43 = vsel %vm337_vm0, %v390_v42, 0.0  ;;  %v391_v52 = vsel %vm337_vm0, %v389_v49, 0.0 }
 0x10b   : > { %v416_v54 = vsel %vm337_vm0, %v415_v53, 0.0 }
 0x10d   : > { %370 = vadd.xlane.f32.xlu0 %v369_v41 }
 0x111   : > { %395 = vadd.xlane.f32.xlu0 %v394_v43 }
 0x192   : > { %v368_v44 = vpop.xlane.xlu0 %367 }
 0x193   : > { %v377_v47 = vrot.slane %v368_v44, %v376_v45 }
 0x196   : > { %v371_v46 = vpop.xlane.xlu0 %370 }
 0x197   : > { %v381_v48 = vrot.slane %v371_v46, %v376_v45 }
 0x199   : > { %v383_v50 = vsel %vm382_vm3, %v381_v48, %v377_v47 }
 0x19a   : > { %797 = vmatpush3.xpose.msk.msra.mxu0 %vm337_vm0, %v383_v50  ;;  %v386_v51 = vsel %vm385_vm4, %v383_v50, 0.0  ;;  %v396_v56 = vpop.xlane.xlu0 %395 }
 0x19b   : > { %387 = vadd.xlane.f32.xlu1 %v386_v51  ;;  %806 = vmatprep.subr.mxu0 %v994_v32  ;;  %v406_v57 = vrot.slane %v396_v56, %v376_v45 }
 0x19d   : > { %799 = vmatmul.mubr.msk.f32.vlgmr.msra.gmra.mxu0 %vm337_vm0, %v383_v50 }
 0x19e   : > { %808 = vmatprep.mubr.msk.f32.mxu0 %vm995_vm2, %v994_v32 }
 0x19f   : > { %392 = vadd.xlane.f32.xlu1 %v391_v52 }
 0x1a3   : > { %417 = vadd.xlane.f32.xlu1 %v416_v54 }
 0x224   : > { %v388_v55 = vpop.xlane.xlu1 %387 }
 0x225   : > { %802 = vmatpush3.xpose.msk.msra.mxu1 %vm337_vm0, %v388_v55 }
 0x228   : > { %804 = vmatmul.mubr.msk.f32.vlgmr.msra.gmra.mxu1 %vm337_vm0, %v383_v50  ;;  %v393_v58 = vpop.xlane.xlu1 %392 }
 0x229   : > { %v402_v59 = vrot.slane %v393_v58, %v376_v45 }
 0x22b   : > { %v407_v60 = vsel %vm382_vm3, %v406_v57, %v402_v59 }
 0x22c   : > { %v418_v61 = vpop.xlane.xlu1 %417  ;;  %v409_v62 = vsel %vm385_vm4, %v407_v60, 0.0 }
 0x22d   : > { %v423_v63 = vrot.slane %v418_v61, %v376_v45  ;;  %410 = vadd.xlane.f32.xlu0 %v409_v62 }
 0x22f   : > { %v424_v0 = vsel %vm382_vm3, %v423_v63, %v406_v57 }
 0x230   : > { %v426_v1 = vsel %vm385_vm4, %v424_v0, 0.0 }
 0x231   : > { %427 = vadd.xlane.f32.xlu1 %v426_v1 }
 0x25d   : > { %v500_v2 = vpop.f32.mrf.mxu0 }
 0x25e   : > { %v579_v12 = vmul.f32 0.33333334, %v500_v2 }
 0x25f   : > { %v800_v3 = vpop.f32.mrf.mxu0 }
 0x2b6   : > { %v411_v5 = vpop.xlane.xlu0 %410 }
 0x2b7   : > { %v413_v7 = vsel %vm412_vm6, %v411_v5, 0.0 }
 0x2ba   : > { %v428_v4 = vpop.xlane.xlu1 %427 }
 0x2bb   : > { %v430_v6 = vsel %vm429_vm5, %v428_v4, 0.0 }
 0x2bc   : > { %v431_v9 = vadd.f32 %v430_v6, %v413_v7 }
 0x2e8   : > { %v573_v8 = vpop.f32.mrf.mxu1 }
 0x2e9   : > { %v577_v10 = vmul.f32 0.023809524, %v573_v8 }
 0x2ea   : > { %v805_v11 = vpop.f32.mrf.mxu1 }
 0x2eb   : > { %v578_v13 = vadd.f32 %v577_v10, %v431_v9 }
 0x2ed   : > { %v580_v14 = vsub.f32 %v578_v13, %v579_v12 }
 0x2ef   : > { %v581_v16 = vmul.f32 0.025, %v580_v14 }
 0x2f1   : > { %v585_v17 = vmul.f32 %v780_v15, %v581_v16 }
 0x2f3   : > { %v587_v18 = vsel %vm586_vm8, %v585_v17, 0.0 }
 0x2f4   : > { %588 = vadd.xlane.f32.xlu0 %v587_v18 }
 0x37d   : > { %v589_v19 = vpop.xlane.xlu0 %588 }
 0x37e   : > { %v590_v20 = vmax.f32 %v589_v19, 0.0 }
 0x380   : > { %807 = vmatpush3.xpose.msk.msra.mxu0 %vm337_vm0, %v590_v20 }
 0x383   : > { %809 = vmatmul.mubr.msk.f32.vlgmr.msra.gmra.mxu0 %vm337_vm0, %v590_v20 }
 0x443   : > { %v660_v21 = vpop.f32.mrf.mxu0 }
 0x444   : > { %v664_v22 = vmul.f32 0.125, %v660_v21 }
 0x445   : > { %v810_v23 = vpop.f32.mrf.mxu0 }
 0x446   : > { %v665_v24 = vmax.f32 %v664_v22, 1e-16 }
 0x448   : > { %883 = vrsqrt.f32 %v665_v24 }
 0x455   : > { %v884_v25 = vpop.eup %883 }
 0x456   : > { %v667_v26 = vmul.f32 %v884_v25, %v581_v16 }
 0x458   : > { %v671_v28 = vand.u32 2147483647, %v667_v26 }
 0x45a   : > { %v672_v29 = vmul.f32 %v783_v27, %v671_v28 }
 0x45c   : > { %v673_v30 = vsel %vm586_vm8, %v672_v29, 0.0 }
 0x45d   : > { %674 = vadd.xlane.f32.xlu1 %v673_v30 }
 0x4e6   : > { %v675_v31 = vpop.xlane.xlu1 %674 }
 0x4e7   : > { %v677_v35 = vsel %vm676_vm10, %v675_v31, 0.0 }
 0x4e8   : > { %v678_v36 = vrot.slane %v677_v35, 4 }
 0x4ea   : > { %v679_v37 = vadd.f32 %v678_v36, %v677_v35 }
 0x4ec   : > { %v680_v38 = vrot.slane %v679_v37, 2 }
 0x4ee   : > { %v681_v39 = vadd.f32 %v680_v38, %v679_v37 }
 0x4f0   : > { %v682_v40 = vrot.slane %v681_v39, 1 }
 0x4f2   : > { %v683_v41 = vadd.f32 %v682_v40, %v681_v39 }
 0x4f4   : > { %684 = vst [vmem:[#allocation6] sm:$0x1] %v683_v41 }
 0x4f5 PF: > { %p1138_p8 = scmp.eq.s32.totalorder %s756_s12, 1  ;;  %s996_s17 = smov [#allocation6]  }
 0x4f6   : > { %s692_s19 = sshll.u32 %s996_s17, 4  ;;  %s693_s19 = int_to_ptr.vmem [resolvable:$true] %s692_s19 }
 0x4f7   : > { %s913_s20 = scalar_lea.vmem %s693_s19, 16  ;;  %s919_s21 = scalar_lea.vmem %s693_s19, 32 }
 0x4f8   : > { %p914_p9 = scmp.ne.s32.totalorder %s693_s19, %s913_s20  ;;  %p920_p12 = scmp.lt.s32.totalorder %s693_s19, %s693_s19 }
 0x4f9   : > { %p921_p13 = scmp.lt.s32.totalorder %s919_s21, %s913_s20 }
 0x4fa   : > { %p915_p10 = pnand %p914_p9, %p1138_p8 }
 0x4fb   : > { %p922_p0 = por %p921_p13, %p920_p12 }
 0x4fc   : > { %p916_p11 = pneg %p915_p10 }
 0x4fe   : > { %p923_p1 = pnand %p922_p0, %p916_p11 }
 0x500   : > { %926 = shalt.err (!%p923_p1)
}
 0x501   : > { %814 = dma.vmem_to_hbm [thread:$0]  (%p1138_p8), %s693_s19, 16, %s1172_s1, [#allocation5]  }
 0x502   : > { %966 = dma.done.wait (%p1138_p8), [#allocation5], 16  }
 0x503   : > { %968 = vsyncadd (%p1138_p8), [#allocation5], 4294967280 }
 0x504 PF: > { %s15_s11 = sadd.s32 1, %s991_s11   ;;  %s1177_s6 = smov %s975_s7 }
 0x505   : > { %p12_p2 = scmp.ge.s32.totalorder %s15_s11, 4   ;;  %s1178_s7 = smov %s979_s8 }
 0x506   : > { %s1179_s8 = smov %s1058_s18  ;;  %s1180_s9 = smov %s987_s10 }
 0x507   : > { %s1181_s10 = smov %s1183_s13  ;;  %14 = sbr.rel (!%p12_p2) target bundleno = 5 (0x5), region = 75 }
 0x50c   :  { %705 = vsyncpa [#allocation4], 1 }
 0x50d   :  { %707 = vsyncpa [#allocation4 + $0x1], 1 }
 0x50e   :  { %708 = vsyncpa [#allocation5], 1 }
 0x50f   :  { %710 = vsyncpa [#allocation5 + $0x1], 1 }

</bundles_post_ra>
